<compile_context>
chip_gen: v5e
topology: v5e:2x2
jax: 0.10.0
libtpu: 0.0.40
codegen_flags: <defaults>
</compile_context>

<pallas_src>
import functools

import jax
import jax.numpy as jnp
from jax.experimental import pallas as pl
from jax.experimental.pallas import tpu as pltpu

LANE = 128          # TPU lane width (last-dim tiling)
BF16_SUBLANES = 16  # bf16 packs 2 rows per 32-bit sublane -> native tile is (16, 128)


def _round_up(x, m):
    return (x + m - 1) // m * m


# ------------------------------ Pallas kernel ------------------------------ #

def _mlp_kernel(x_ref, w1_ref, b1_ref, w2_ref, b2_ref, w3_ref, b3_ref, o_ref):
    # x_ref : (TN, Din_p)  bf16, lane-dense batch tile
    # w*_ref: (Din_p,H_p) / (H_p,H_p) / (H_p,O_p)  bf16, padded, pre-transposed
    # b*_ref: (1, H_p) / (1, H_p) / (1, O_p)       f32
    # o_ref : (TN, O_p)                            f32
    h = jnp.dot(x_ref[...], w1_ref[...], preferred_element_type=jnp.float32)
    h = jnp.maximum(h + b1_ref[...], 0.0).astype(jnp.bfloat16)
    h = jnp.dot(h, w2_ref[...], preferred_element_type=jnp.float32)
    h = jnp.maximum(h + b2_ref[...], 0.0).astype(jnp.bfloat16)
    o = jnp.dot(h, w3_ref[...], preferred_element_type=jnp.float32) + b3_ref[...]
    o_ref[...] = o.astype(o_ref.dtype)


# ----------------------- params / one-time preparation --------------------- #

def init_params(key, dim_in, dim_hidden, dim_out):
    """Torch-style nn.Linear params: weight (out, in), bias (out,)."""
    ks = jax.random.split(key, 6)

    def linear_init(kw, kb, fan_in, fan_out):
        bound = 1.0 / jnp.sqrt(fan_in)
        w = jax.random.uniform(kw, (fan_out, fan_in), jnp.float32, -bound, bound)
        b = jax.random.uniform(kb, (fan_out,), jnp.float32, -bound, bound)
        return w, b

    w1, b1 = linear_init(ks[0], ks[1], dim_in, dim_hidden)
    w2, b2 = linear_init(ks[2], ks[3], dim_hidden, dim_hidden)
    w3, b3 = linear_init(ks[4], ks[5], dim_hidden, dim_out)
    return dict(w1=w1, b1=b1, w2=w2, b2=b2, w3=w3, b3=b3)


def prepare_params(params):
    """One-time: transpose to (in, out), zero-pad to multiples of 128, cast weights to bf16.

    Zero padding keeps the math exact (zero weight rows/cols and zero bias entries
    contribute nothing, and ReLU(0) = 0).  Biases stay f32 for an exact bias add.
    """
    w1, b1 = params["w1"], params["b1"]
    w2, b2 = params["w2"], params["b2"]
    w3, b3 = params["w3"], params["b3"]
    din, h, o = w1.shape[1], w1.shape[0], w3.shape[0]
    din_p = _round_up(din, LANE)
    h_p = _round_up(h, LANE)
    o_p = _round_up(o, LANE)

    def pad_wt(w, rows, cols):
        buf = jnp.zeros((rows, cols), jnp.float32)
        buf = buf.at[: w.shape[1], : w.shape[0]].set(w.T.astype(jnp.float32))
        return buf.astype(jnp.bfloat16)

    def pad_b(b, cols):
        buf = jnp.zeros((1, cols), jnp.float32)
        return buf.at[:, : b.shape[0]].set(b.astype(jnp.float32))

    return dict(
        w1=pad_wt(w1, din_p, h_p), b1=pad_b(b1, h_p),
        w2=pad_wt(w2, h_p, h_p),   b2=pad_b(b2, h_p),
        w3=pad_wt(w3, h_p, o_p),   b3=pad_b(b3, o_p),
    )


# -------------------------------- forward ---------------------------------- #

def _choose_batch_tile(n, batch_tile):
    """bf16-friendly batch tile; >=2 grid steps when the batch allows (v7x megacore)."""
    batch_tile = max(BF16_SUBLANES, _round_up(batch_tile, BF16_SUBLANES))
    if n <= 2 * BF16_SUBLANES:
        return _round_up(max(n, 1), BF16_SUBLANES)
    half = _round_up(pl.cdiv(n, 2), BF16_SUBLANES)
    return min(batch_tile, half)


@functools.partial(jax.jit, static_argnames=("dim_out", "batch_tile"))
def mlp_forward(prepped, x, *, dim_out, batch_tile=512):
    n = x.shape[0]
    # torch: x.view(-1, C*H*W) on a contiguous NCHW tensor == reshape(N, C*H*W)
    flat = x.reshape(n, -1)
    din = flat.shape[1]

    din_p = prepped["w1"].shape[0]
    h_p = prepped["w1"].shape[1]
    o_p = prepped["w3"].shape[1]

    tn = _choose_batch_tile(n, batch_tile)
    n_p = _round_up(n, tn)

    xb = flat.astype(jnp.bfloat16)
    if n_p != n or din_p != din:          # static shapes -> pad only when needed
        xb = jnp.pad(xb, ((0, n_p - n), (0, din_p - din)))

    # VMEM budget: bf16 weights (assume worst-case double-buffered), f32 biases,
    # double-buffered in/out batch tiles, f32 intermediates; +30% headroom,
    # capped at 64 MiB so the limit is valid on v7x as well.
    weight_bytes = 2 * (din_p * h_p + h_p * h_p + h_p * o_p)        # bf16
    bias_bytes = 4 * (2 * h_p + o_p)                                # f32
    io_bytes = 2 * tn * din_p * 2 + 2 * tn * o_p * 4                # 2x in + 2x out tiles
    interm_bytes = 3 * tn * h_p * 4                                 # f32 h1/h2 + slack
    vmem_limit = int(1.3 * (2 * weight_bytes + bias_bytes + io_bytes + interm_bytes))
    vmem_limit = min(max(vmem_limit, 4 * 1024 * 1024), 64 * 1024 * 1024)

    weight_mode = pl.Buffered(1)  # grid-invariant: no double-buffering needed

    out_p = pl.pallas_call(
        _mlp_kernel,
        out_shape=jax.ShapeDtypeStruct((n_p, o_p), jnp.float32),
        grid_spec=pltpu.PrefetchScalarGridSpec(
            num_scalar_prefetch=0,
            grid=(n_p // tn,),
            in_specs=[
                pl.BlockSpec((tn, din_p), lambda i: (i, 0)),                                # x tile
                pl.BlockSpec((din_p, h_p), lambda i: (0, 0), pipeline_mode=weight_mode),    # w1
                pl.BlockSpec((1, h_p), lambda i: (0, 0), pipeline_mode=weight_mode),        # b1
                pl.BlockSpec((h_p, h_p), lambda i: (0, 0), pipeline_mode=weight_mode),      # w2
                pl.BlockSpec((1, h_p), lambda i: (0, 0), pipeline_mode=weight_mode),        # b2
                pl.BlockSpec((h_p, o_p), lambda i: (0, 0), pipeline_mode=weight_mode),      # w3
                pl.BlockSpec((1, o_p), lambda i: (0, 0), pipeline_mode=weight_mode),        # b3
            ],
            out_specs=pl.BlockSpec((tn, o_p), lambda i: (i, 0)),
        ),
        compiler_params=pltpu.CompilerParams(
            dimension_semantics=("parallel",),
            vmem_limit_bytes=vmem_limit,
        ),
    )(xb, prepped["w1"], prepped["b1"], prepped["w2"], prepped["b2"],
      prepped["w3"], prepped["b3"])

    return out_p[:n, :dim_out]


def mlp_reference(params, x):
    flat = x.reshape(x.shape[0], -1).astype(jnp.float32)
    h = jnp.maximum(flat @ params["w1"].T + params["b1"], 0.0)
    h = jnp.maximum(h @ params["w2"].T + params["b2"], 0.0)
    return h @ params["w3"].T + params["b3"]


if __name__ == "__main__":
    key = jax.random.PRNGKey(0)
    pkey, xkey = jax.random.split(key)

    # Small shapes consistent with the module: batch=2, channels=4, 16x16 spatial.
    B, C, H, W = 2, 4, 16, 16
    dim_in = C * H * W          # matches x.view(-1, x.shape[1]*x.shape[-2]*x.shape[-1])
    dim_hidden, dim_out = 32, 10

    params = init_params(pkey, dim_in, dim_hidden, dim_out)
    prepped = prepare_params(params)        # one-time transpose + pad + bf16 cast
    x = jax.random.normal(xkey, (B, C, H, W), jnp.float32)

    out = mlp_forward(prepped, x, dim_out=dim_out, batch_tile=512)
    jax.block_until_ready(out)
    assert out.shape == (B, dim_out), out.shape

    ref = mlp_reference(params, x)
    err = float(jnp.max(jnp.abs(out - ref)))
    # bf16 operands with f32 accumulation: expect ~1e-2-scale deviation vs f32 ref.
    assert err < 5e-2, f"max abs err vs reference: {err}"
    print("KERNEL_OK")
</pallas_src>

<mosaic_0001>
module attributes {stable_mosaic.version = 11 : i64} {
  func.func @_mlp_kernel(%arg0: i32, %arg1: memref<16x1024xbf16, #tpu.memory_space<vmem>>, %arg2: memref<1024x128xbf16, #tpu.memory_space<vmem>>, %arg3: memref<1x128xf32, #tpu.memory_space<vmem>>, %arg4: memref<128x128xbf16, #tpu.memory_space<vmem>>, %arg5: memref<1x128xf32, #tpu.memory_space<vmem>>, %arg6: memref<128x128xbf16, #tpu.memory_space<vmem>>, %arg7: memref<1x128xf32, #tpu.memory_space<vmem>>, %arg8: memref<16x128xf32, #tpu.memory_space<vmem>>) attributes {dimension_semantics = [#tpu.dimension_semantics<parallel>], iteration_bounds = array<i64: 1>, scalar_prefetch = 0 : i64, scratch_operands = 0 : i64, tpu.core_type = #tpu.core_type<tc>, window_params = [{transform_indices = @transform_0, window_bounds = array<i64: 16, 1024>}, {pipeline_mode = #tpu.pipeline_mode<synchronous>, transform_indices = @transform_1, window_bounds = array<i64: 1024, 128>}, {pipeline_mode = #tpu.pipeline_mode<synchronous>, transform_indices = @transform_2, window_bounds = array<i64: 1, 128>}, {pipeline_mode = #tpu.pipeline_mode<synchronous>, transform_indices = @transform_3, window_bounds = array<i64: 128, 128>}, {pipeline_mode = #tpu.pipeline_mode<synchronous>, transform_indices = @transform_4, window_bounds = array<i64: 1, 128>}, {pipeline_mode = #tpu.pipeline_mode<synchronous>, transform_indices = @transform_5, window_bounds = array<i64: 128, 128>}, {pipeline_mode = #tpu.pipeline_mode<synchronous>, transform_indices = @transform_6, window_bounds = array<i64: 1, 128>}, {transform_indices = @transform_7, window_bounds = array<i64: 16, 128>}]} {
    %c0 = arith.constant 0 : index
    %c0_0 = arith.constant 0 : index
    %0 = vector.load %arg1[%c0, %c0_0] : memref<16x1024xbf16, #tpu.memory_space<vmem>>, vector<16x1024xbf16>
    %c0_1 = arith.constant 0 : index
    %c0_2 = arith.constant 0 : index
    %1 = vector.load %arg2[%c0_1, %c0_2] : memref<1024x128xbf16, #tpu.memory_space<vmem>>, vector<1024x128xbf16>
    %cst = arith.constant dense<0.000000e+00> : vector<16x128xf32>
    %2 = tpu.matmul %0, %1, %cst {dimension_numbers = #tpu.dot_dimension_numbers<[1], [0], [0], [1], [0, 0, 1, 1], [], []>} : vector<16x1024xbf16>, vector<1024x128xbf16>, vector<16x128xf32> -> vector<16x128xf32>
    %c0_3 = arith.constant 0 : index
    %c0_4 = arith.constant 0 : index
    %3 = vector.load %arg3[%c0_3, %c0_4] : memref<1x128xf32, #tpu.memory_space<vmem>>, vector<1x128xf32>
    %4 = vector.broadcast %3 : vector<1x128xf32> to vector<16x128xf32>
    %5 = arith.addf %2, %4 : vector<16x128xf32>
    %cst_5 = arith.constant 0.000000e+00 : f32
    %6 = vector.broadcast %cst_5 : f32 to vector<16x128xf32>
    %7 = arith.maximumf %5, %6 : vector<16x128xf32>
    %8 = arith.truncf %7 : vector<16x128xf32> to vector<16x128xbf16>
    %c0_6 = arith.constant 0 : index
    %c0_7 = arith.constant 0 : index
    %9 = vector.load %arg4[%c0_6, %c0_7] : memref<128x128xbf16, #tpu.memory_space<vmem>>, vector<128x128xbf16>
    %cst_8 = arith.constant dense<0.000000e+00> : vector<16x128xf32>
    %10 = tpu.matmul %8, %9, %cst_8 {dimension_numbers = #tpu.dot_dimension_numbers<[1], [0], [0], [1], [0, 0, 1, 1], [], []>} : vector<16x128xbf16>, vector<128x128xbf16>, vector<16x128xf32> -> vector<16x128xf32>
    %c0_9 = arith.constant 0 : index
    %c0_10 = arith.constant 0 : index
    %11 = vector.load %arg5[%c0_9, %c0_10] : memref<1x128xf32, #tpu.memory_space<vmem>>, vector<1x128xf32>
    %12 = vector.broadcast %11 : vector<1x128xf32> to vector<16x128xf32>
    %13 = arith.addf %10, %12 : vector<16x128xf32>
    %cst_11 = arith.constant 0.000000e+00 : f32
    %14 = vector.broadcast %cst_11 : f32 to vector<16x128xf32>
    %15 = arith.maximumf %13, %14 : vector<16x128xf32>
    %16 = arith.truncf %15 : vector<16x128xf32> to vector<16x128xbf16>
    %c0_12 = arith.constant 0 : index
    %c0_13 = arith.constant 0 : index
    %17 = vector.load %arg6[%c0_12, %c0_13] : memref<128x128xbf16, #tpu.memory_space<vmem>>, vector<128x128xbf16>
    %cst_14 = arith.constant dense<0.000000e+00> : vector<16x128xf32>
    %18 = tpu.matmul %16, %17, %cst_14 {dimension_numbers = #tpu.dot_dimension_numbers<[1], [0], [0], [1], [0, 0, 1, 1], [], []>} : vector<16x128xbf16>, vector<128x128xbf16>, vector<16x128xf32> -> vector<16x128xf32>
    %c0_15 = arith.constant 0 : index
    %c0_16 = arith.constant 0 : index
    %19 = vector.load %arg7[%c0_15, %c0_16] : memref<1x128xf32, #tpu.memory_space<vmem>>, vector<1x128xf32>
    %20 = vector.broadcast %19 : vector<1x128xf32> to vector<16x128xf32>
    %21 = arith.addf %18, %20 : vector<16x128xf32>
    %c0_17 = arith.constant 0 : index
    %c0_18 = arith.constant 0 : index
    %22 = vector.load %arg8[%c0_17, %c0_18] : memref<16x128xf32, #tpu.memory_space<vmem>>, vector<16x128xf32>
    tpu.vector_store %arg8[%c0_17, %c0_18], %21 {strides = array<i32>} : memref<16x128xf32, #tpu.memory_space<vmem>>, vector<16x128xf32>,
    return
  }
  func.func @transform_0(%arg0: i32) -> (i32, i32) {
    %c0_i32 = arith.constant 0 : i32
    %c0_i32_0 = arith.constant 0 : i32
    return %arg0, %c0_i32 : i32, i32
  }
  func.func @transform_1(%arg0: i32) -> (i32, i32) {
    %c0_i32 = arith.constant 0 : i32
    %c0_i32_0 = arith.constant 0 : i32
    %c0_i32_1 = arith.constant 0 : i32
    return %c0_i32, %c0_i32_0 : i32, i32
  }
  func.func @transform_2(%arg0: i32) -> (i32, i32) {
    %c0_i32 = arith.constant 0 : i32
    %c0_i32_0 = arith.constant 0 : i32
    %c0_i32_1 = arith.constant 0 : i32
    return %c0_i32, %c0_i32_0 : i32, i32
  }
  func.func @transform_3(%arg0: i32) -> (i32, i32) {
    %c0_i32 = arith.constant 0 : i32
    %c0_i32_0 = arith.constant 0 : i32
    %c0_i32_1 = arith.constant 0 : i32
    return %c0_i32, %c0_i32_0 : i32, i32
  }
  func.func @transform_4(%arg0: i32) -> (i32, i32) {
    %c0_i32 = arith.constant 0 : i32
    %c0_i32_0 = arith.constant 0 : i32
    %c0_i32_1 = arith.constant 0 : i32
    return %c0_i32, %c0_i32_0 : i32, i32
  }
  func.func @transform_5(%arg0: i32) -> (i32, i32) {
    %c0_i32 = arith.constant 0 : i32
    %c0_i32_0 = arith.constant 0 : i32
    %c0_i32_1 = arith.constant 0 : i32
    return %c0_i32, %c0_i32_0 : i32, i32
  }
  func.func @transform_6(%arg0: i32) -> (i32, i32) {
    %c0_i32 = arith.constant 0 : i32
    %c0_i32_0 = arith.constant 0 : i32
    %c0_i32_1 = arith.constant 0 : i32
    return %c0_i32, %c0_i32_0 : i32, i32
  }
  func.func @transform_7(%arg0: i32) -> (i32, i32) {
    %c0_i32 = arith.constant 0 : i32
    %c0_i32_0 = arith.constant 0 : i32
    return %arg0, %c0_i32 : i32, i32
  }
}

</mosaic_0001>

<bundles_post_ra>
// kernel: mlp_forward.1
= control target key start
LH: loop header
LB: loop body
LE: loop exit
PB: predicated region body
PF: predicated region fallthrough
CT: control target
= control target key end

     0   :  { %12 = vsyncpa [#allocation3], 0  ;;  %s1367_s27 = smov [#allocation2]   ;;  %s1368_s29 = smov 64   ;;  %s1524_s0 = inlined_call_operand.vmem [shape: bf16[16,1024], index: 0, kind: input, shape index: {}]   ;;  %s1525_s1 = inlined_call_operand.hbm [shape: bf16[1024,128], index: 1, kind: input, shape index: {}]   ;;  %s1526_s2 = inlined_call_operand.vmem [shape: f32[1,128], index: 2, kind: input, shape index: {}]   ;;  %s1527_s3 = inlined_call_operand.vmem [shape: bf16[128,128], index: 3, kind: input, shape index: {}]   ;;  %s1528_s4 = inlined_call_operand.vmem [shape: f32[1,128], index: 4, kind: input, shape index: {}]   ;;  %s1529_s5 = inlined_call_operand.vmem [shape: bf16[128,128], index: 5, kind: input, shape index: {}]   ;;  %s1530_s6 = inlined_call_operand.vmem [shape: f32[1,128], index: 6, kind: input, shape index: {}]   ;;  %s1531_s7 = inlined_call_operand.vmem [shape: f32[16,128], index: 7, kind: output, shape index: {}]  }
   0x1   :  { %s19_s26 = sshll.u32 %s1525_s1, 4  ;;  %s21_s28 = sshll.u32 %s1367_s27, 4  ;;  %s20_s26 = int_to_ptr.hbm [resolvable:$true] %s19_s26  ;;  %s22_s28 = int_to_ptr.vmem [resolvable:$true] %s21_s28 }
   0x2   :  { %s1369_s30 = smov 4  }
   0x3   :  { %27 = dma.hbm_to_vmem [thread:$0]  %s20_s26, 8192, %s22_s28, [#allocation3], %s1368_s29, %s1368_s29, %s1369_s30  }
   0x4   :  { %1365 = dma.done.wait [#allocation3], 8192  }
   0x5   :  { %1366 = vsyncadd [#allocation3], 4294959104  ;;  %v1262_v0 = vld [vmem:[#allocation2 + $0x38] sm:$0xff]  ;;  %v1261_v4 = vld [vmem:[#allocation2 + $0x30] sm:$0xff] }
   0x6   :  { %v1270_v1 = vld [vmem:[#allocation2 + $0x78] sm:$0xff]  ;;  %606 = vmatpush.bf16.msra.mxu0 %v1262_v0  ;;  %v1269_v5 = vld [vmem:[#allocation2 + $0x70] sm:$0xff]  ;;  %v1260_v8 = vld [vmem:[#allocation2 + $0x28] sm:$0xff] }
   0x7   :  { %v1278_v2 = vld [vmem:[#allocation2 + $0xb8] sm:$0xff]  ;;  %620 = vmatpush.bf16.msra.mxu1 %v1270_v1  ;;  %v1277_v6 = vld [vmem:[#allocation2 + $0xb0] sm:$0xff]  ;;  %v1268_v9 = vld [vmem:[#allocation2 + $0x68] sm:$0xff] }
   0x8   :  { %v1286_v3 = vld [vmem:[#allocation2 + $0xf8] sm:$0xff]  ;;  %634 = vmatpush.bf16.msra.mxu2 %v1278_v2  ;;  %v1285_v7 = vld [vmem:[#allocation2 + $0xf0] sm:$0xff]  ;;  %v1276_v10 = vld [vmem:[#allocation2 + $0xa8] sm:$0xff] }
   0x9   :  { %648 = vmatpush.bf16.msra.mxu3 %v1286_v3  ;;  %v1284_v11 = vld [vmem:[#allocation2 + $0xe8] sm:$0xff]  ;;  %v1259_v12 = vld [vmem:[#allocation2 + $0x20] sm:$0xff]  ;;  %v1258_v16 = vld [vmem:[#allocation2 + $0x18] sm:$0xff] }
   0xa   :  { %607 = vmatpush.bf16.msra.mxu0 %v1261_v4  ;;  %v1267_v13 = vld [vmem:[#allocation2 + $0x60] sm:$0xff]  ;;  %v1266_v17 = vld [vmem:[#allocation2 + $0x58] sm:$0xff]  ;;  %v1257_v20 = vld [vmem:[#allocation2 + $0x10] sm:$0xff] }
   0xb   :  { %621 = vmatpush.bf16.msra.mxu1 %v1269_v5  ;;  %v1275_v14 = vld [vmem:[#allocation2 + $0xa0] sm:$0xff]  ;;  %v1274_v18 = vld [vmem:[#allocation2 + $0x98] sm:$0xff]  ;;  %v1265_v21 = vld [vmem:[#allocation2 + $0x50] sm:$0xff] }
   0xc   :  { %635 = vmatpush.bf16.msra.mxu2 %v1277_v6  ;;  %v1283_v15 = vld [vmem:[#allocation2 + $0xe0] sm:$0xff]  ;;  %v1282_v19 = vld [vmem:[#allocation2 + $0xd8] sm:$0xff]  ;;  %v1273_v22 = vld [vmem:[#allocation2 + $0x90] sm:$0xff] }
   0xd   :  { %649 = vmatpush.bf16.msra.mxu3 %v1285_v7  ;;  %v1281_v23 = vld [vmem:[#allocation2 + $0xd0] sm:$0xff]  ;;  %v1256_v24 = vld [vmem:[#allocation2 + $0x8] sm:$0xff]  ;;  %v1255_v28 = vld [vmem:[#allocation2] sm:$0xff] }
   0xe   :  { %608 = vmatpush.bf16.msra.mxu0 %v1260_v8  ;;  %v1264_v25 = vld [vmem:[#allocation2 + $0x48] sm:$0xff]  ;;  %v1263_v29 = vld [vmem:[#allocation2 + $0x40] sm:$0xff]  ;;  %v1294_v32 = vld [vmem:[#allocation2 + $0x138] sm:$0xff] }
   0xf   :  { %622 = vmatpush.bf16.msra.mxu1 %v1268_v9  ;;  %v1272_v26 = vld [vmem:[#allocation2 + $0x88] sm:$0xff]  ;;  %v1271_v30 = vld [vmem:[#allocation2 + $0x80] sm:$0xff]  ;;  %v1302_v33 = vld [vmem:[#allocation2 + $0x178] sm:$0xff] }
  0x10   :  { %636 = vmatpush.bf16.msra.mxu2 %v1276_v10  ;;  %v1280_v27 = vld [vmem:[#allocation2 + $0xc8] sm:$0xff]  ;;  %v1279_v31 = vld [vmem:[#allocation2 + $0xc0] sm:$0xff]  ;;  %v1310_v42 = vld [vmem:[#allocation2 + $0x1b8] sm:$0xff] }
  0x11   :  { %650 = vmatpush.bf16.msra.mxu3 %v1284_v11  ;;  %v905_v34 = vld [vmem:[%s1524_s0 + $0x8] sm:$0xf]  ;;  %v897_v36 = vld [vmem:[%s1524_s0] sm:$0xf]  ;;  %v1248_v38 = vld [vmem:[%s1524_s0 + $0xc] sm:$0xf] }
  0x12   :  { %609 = vmatpush.bf16.msra.mxu0 %v1259_v12  ;;  %v1252_v35 = vld [vmem:[%s1524_s0 + $0x24] sm:$0xf0]  ;;  %v1251_v37 = vld [vmem:[%s1524_s0 + $0x1c] sm:$0xf0]  ;;  %v907_v39 = vld [vmem:[%s1524_s0 + $0x28] sm:$0xf0] }
  0x13   :  { %623 = vmatpush.bf16.msra.mxu1 %v1267_v13  ;;  %v1247_v40 = vld [vmem:[%s1524_s0 + $0x4] sm:$0xf]  ;;  %v1318_v43 = vld [vmem:[#allocation2 + $0x1f8] sm:$0xff]  ;;  %v906_v44 = vor.u32 %v1252_v35, %v905_v34  ;;  %v898_v45 = vor.u32 %v1251_v37, %v897_v36  ;;  %v910_v46 = vor.u32 %v1248_v38, %v907_v39  ;;  %v1293_v48 = vld [vmem:[#allocation2 + $0x130] sm:$0xff] }
  0x14   :  { %637 = vmatpush.bf16.msra.mxu2 %v1275_v14  ;;  %v899_v41 = vld [vmem:[%s1524_s0 + $0x20] sm:$0xf0]  ;;  %v1301_v49 = vld [vmem:[#allocation2 + $0x170] sm:$0xff]  ;;  %v1292_v52 = vld [vmem:[#allocation2 + $0x128] sm:$0xff] }
  0x15   :  { %651 = vmatpush.bf16.msra.mxu3 %v1283_v15  ;;  %v902_v47 = vor.u32 %v1247_v40, %v899_v41  ;;  %v1309_v50 = vld [vmem:[#allocation2 + $0x1b0] sm:$0xff]  ;;  %v1300_v53 = vld [vmem:[#allocation2 + $0x168] sm:$0xff]  ;;  %v1291_v56 = vld [vmem:[#allocation2 + $0x120] sm:$0xff] }
  0x16   :  { %610 = vmatpush.bf16.msra.mxu0 %v1258_v16  ;;  %v1317_v51 = vld [vmem:[#allocation2 + $0x1f0] sm:$0xff]  ;;  %v1308_v54 = vld [vmem:[#allocation2 + $0x1a8] sm:$0xff]  ;;  %v1299_v57 = vld [vmem:[#allocation2 + $0x160] sm:$0xff] }
  0x17   :  { %624 = vmatpush.bf16.msra.mxu1 %v1266_v17  ;;  %v1316_v55 = vld [vmem:[#allocation2 + $0x1e8] sm:$0xff]  ;;  %v1307_v58 = vld [vmem:[#allocation2 + $0x1a0] sm:$0xff]  ;;  %v1290_v60 = vld [vmem:[#allocation2 + $0x118] sm:$0xff] }
  0x18   :  { %638 = vmatpush.bf16.msra.mxu2 %v1274_v18  ;;  %v1315_v59 = vld [vmem:[#allocation2 + $0x1e0] sm:$0xff]  ;;  %v1298_v61 = vld [vmem:[#allocation2 + $0x158] sm:$0xff]  ;;  %v1289_v0 = vld [vmem:[#allocation2 + $0x110] sm:$0xff] }
  0x19   :  { %652 = vmatpush.bf16.msra.mxu3 %v1282_v19  ;;  %v1306_v62 = vld [vmem:[#allocation2 + $0x198] sm:$0xff]  ;;  %v1297_v1 = vld [vmem:[#allocation2 + $0x150] sm:$0xff]  ;;  %v1288_v4 = vld [vmem:[#allocation2 + $0x108] sm:$0xff] }
  0x1a   :  { %611 = vmatpush.bf16.msra.mxu0 %v1257_v20  ;;  %v1314_v63 = vld [vmem:[#allocation2 + $0x1d8] sm:$0xff]  ;;  %v1305_v2 = vld [vmem:[#allocation2 + $0x190] sm:$0xff]  ;;  %v1296_v5 = vld [vmem:[#allocation2 + $0x148] sm:$0xff] }
  0x1b   :  { %625 = vmatpush.bf16.msra.mxu1 %v1265_v21  ;;  %v1313_v3 = vld [vmem:[#allocation2 + $0x1d0] sm:$0xff]  ;;  %v1304_v6 = vld [vmem:[#allocation2 + $0x188] sm:$0xff]  ;;  %v1287_v8 = vld [vmem:[#allocation2 + $0x100] sm:$0xff] }
  0x1c   :  { %639 = vmatpush.bf16.msra.mxu2 %v1273_v22  ;;  %v1312_v7 = vld [vmem:[#allocation2 + $0x1c8] sm:$0xff]  ;;  %v1295_v9 = vld [vmem:[#allocation2 + $0x140] sm:$0xff]  ;;  %v913_v12 = vld [vmem:[%s1524_s0 + $0x10] sm:$0xf] }
  0x1d   :  { %653 = vmatpush.bf16.msra.mxu3 %v1281_v23  ;;  %v1303_v10 = vld [vmem:[#allocation2 + $0x180] sm:$0xff]  ;;  %v1253_v13 = vld [vmem:[%s1524_s0 + $0x2c] sm:$0xf0]  ;;  %v1249_v14 = vld [vmem:[%s1524_s0 + $0x14] sm:$0xf] }
  0x1e   :  { %612 = vmatpush.bf16.msra.mxu0 %v1256_v24  ;;  %v1311_v11 = vld [vmem:[#allocation2 + $0x1c0] sm:$0xff]  ;;  %v915_v15 = vld [vmem:[%s1524_s0 + $0x30] sm:$0xf0]  ;;  %v921_v16 = vld [vmem:[%s1524_s0 + $0x18] sm:$0xf]  ;;  %v914_v20 = vor.u32 %v1253_v13, %v913_v12 }
  0x1f   :  { %626 = vmatpush.bf16.msra.mxu1 %v1264_v25  ;;  %v1254_v17 = vld [vmem:[%s1524_s0 + $0x34] sm:$0xf0]  ;;  %v1250_v18 = vld [vmem:[%s1524_s0 + $0x1c] sm:$0xf]  ;;  %v918_v21 = vor.u32 %v1249_v14, %v915_v15  ;;  %v1325_v25 = vld [vmem:[%s1527_s3 + $0x30] sm:$0xff] }
  0x20   :  { %640 = vmatpush.bf16.msra.mxu2 %v1272_v26  ;;  %v923_v19 = vld [vmem:[%s1524_s0 + $0x38] sm:$0xf0]  ;;  %v922_v22 = vor.u32 %v1254_v17, %v921_v16  ;;  %v1324_v26 = vld [vmem:[%s1527_s3 + $0x28] sm:$0xff]  ;;  %v1338_v34 = vld [vmem:[%s1526_s2] ss:$0 sm:$0xff] }
  0x21   :  { %654 = vmatpush.bf16.msra.mxu3 %v1280_v27  ;;  %v926_v23 = vor.u32 %v1250_v18, %v923_v19  ;;  %v1326_v24 = vld [vmem:[%s1527_s3 + $0x38] sm:$0xff]  ;;  %v1323_v27 = vld [vmem:[%s1527_s3 + $0x20] sm:$0xff]  ;;  %v1333_v40 = vld [vmem:[%s1529_s5 + $0x30] sm:$0xff] }
  0x22   :  { %613 = vmatpush.bf16.msra.mxu0 %v1255_v28  ;;  %v1322_v28 = vld [vmem:[%s1527_s3 + $0x18] sm:$0xff]  ;;  %v1339_v13 = vld [vmem:[%s1528_s4] ss:$0 sm:$0xff] }
  0x23   :  { %627 = vmatpush.bf16.msra.mxu1 %v1263_v29  ;;  %v1321_v29 = vld [vmem:[%s1527_s3 + $0x10] sm:$0xff]  ;;  %v1334_v39 = vld [vmem:[%s1529_s5 + $0x38] sm:$0xff] }
  0x24   :  { %641 = vmatpush.bf16.msra.mxu2 %v1271_v30 }
  0x25   :  { %655 = vmatpush.bf16.msra.mxu3 %v1279_v31  ;;  %614 = vmatmul.bf16.vlgmr.msra.gmra.mxu0 %v898_v45  ;;  %v1320_v31 = vld [vmem:[%s1527_s3 + $0x8] sm:$0xff] }
  0x26   :  { %662 = vmatpush.bf16.msrb.mxu0 %v1294_v32  ;;  %628 = vmatmul.bf16.vlgmr.msra.gmra.mxu1 %v902_v47 }
  0x27   :  { %676 = vmatpush.bf16.msrb.mxu1 %v1302_v33  ;;  %642 = vmatmul.bf16.vlgmr.msra.gmra.mxu2 %v906_v44  ;;  %v1319_v33 = vld [vmem:[%s1527_s3] sm:$0xff]  ;;  %v1332_v44 = vld [vmem:[%s1529_s5 + $0x28] sm:$0xff] }
  0x28   :  { %690 = vmatpush.bf16.msrb.mxu2 %v1310_v42  ;;  %656 = vmatmul.bf16.vlgmr.msra.gmra.mxu3 %v910_v46 }
  0x29   :  { %704 = vmatpush.bf16.msrb.mxu3 %v1318_v43 }
  0x2a   :  { %663 = vmatpush.bf16.msrb.mxu0 %v1293_v48 }
  0x2b   :  { %677 = vmatpush.bf16.msrb.mxu1 %v1301_v49 }
  0x2c   :  { %691 = vmatpush.bf16.msrb.mxu2 %v1309_v50  ;;  %v1331_v50 = vld [vmem:[%s1529_s5 + $0x20] sm:$0xff] }
  0x2d   :  { %705 = vmatpush.bf16.msrb.mxu3 %v1317_v51 }
  0x2e   :  { %664 = vmatpush.bf16.msrb.mxu0 %v1292_v52 }
  0x2f   :  { %678 = vmatpush.bf16.msrb.mxu1 %v1300_v53 }
  0x30   :  { %692 = vmatpush.bf16.msrb.mxu2 %v1308_v54 }
  0x31   :  { %706 = vmatpush.bf16.msrb.mxu3 %v1316_v55 }
  0x32   :  { %665 = vmatpush.bf16.msrb.mxu0 %v1291_v56 }
  0x33   :  { %679 = vmatpush.bf16.msrb.mxu1 %v1299_v57 }
  0x34   :  { %693 = vmatpush.bf16.msrb.mxu2 %v1307_v58 }
  0x35   :  { %707 = vmatpush.bf16.msrb.mxu3 %v1315_v59 }
  0x36   :  { %666 = vmatpush.bf16.msrb.mxu0 %v1290_v60 }
  0x37   :  { %680 = vmatpush.bf16.msrb.mxu1 %v1298_v61 }
  0x38   :  { %694 = vmatpush.bf16.msrb.mxu2 %v1306_v62 }
  0x39   :  { %708 = vmatpush.bf16.msrb.mxu3 %v1314_v63 }
  0x3a   :  { %667 = vmatpush.bf16.msrb.mxu0 %v1289_v0 }
  0x3b   :  { %681 = vmatpush.bf16.msrb.mxu1 %v1297_v1 }
  0x3c   :  { %695 = vmatpush.bf16.msrb.mxu2 %v1305_v2 }
  0x3d   :  { %709 = vmatpush.bf16.msrb.mxu3 %v1313_v3 }
  0x3e   :  { %668 = vmatpush.bf16.msrb.mxu0 %v1288_v4 }
  0x3f   :  { %682 = vmatpush.bf16.msrb.mxu1 %v1296_v5 }
  0x40   :  { %696 = vmatpush.bf16.msrb.mxu2 %v1304_v6 }
  0x41   :  { %710 = vmatpush.bf16.msrb.mxu3 %v1312_v7 }
  0x42   :  { %669 = vmatpush.bf16.msrb.mxu0 %v1287_v8  ;;  %v1330_v8 = vld [vmem:[%s1529_s5 + $0x18] sm:$0xff] }
  0x43   :  { %683 = vmatpush.bf16.msrb.mxu1 %v1295_v9  ;;  %v1329_v9 = vld [vmem:[%s1529_s5 + $0x10] sm:$0xff] }
  0x44   :  { %697 = vmatpush.bf16.msrb.mxu2 %v1303_v10  ;;  %v1328_v10 = vld [vmem:[%s1529_s5 + $0x8] sm:$0xff] }
  0x45   :  { %711 = vmatpush.bf16.msrb.mxu3 %v1311_v11  ;;  %670 = vmatmul.bf16.vlgmr.msrb.gmra.mxu0 %v914_v20  ;;  %v1327_v11 = vld [vmem:[%s1529_s5] sm:$0xff] }
  0x46   :  { %684 = vmatmul.bf16.vlgmr.msrb.gmra.mxu1 %v918_v21  ;;  %789 = vmatpush.bf16.msra.mxu0 %v1326_v24  ;;  %v1340_v20 = vld [vmem:[%s1530_s6] ss:$0 sm:$0xff] }
  0x47   :  { %698 = vmatmul.bf16.vlgmr.msrb.gmra.mxu2 %v922_v22  ;;  %874 = vmatpush.bf16.msra.mxu1 %v1334_v39 }
  0x48   :  { %712 = vmatmul.bf16.vlgmr.msrb.gmra.mxu3 %v926_v23 }
  0x4a   :  { %790 = vmatpush.bf16.msra.mxu0 %v1325_v25 }
  0x4b   :  { %875 = vmatpush.bf16.msra.mxu1 %v1333_v40 }
  0x4e   :  { %791 = vmatpush.bf16.msra.mxu0 %v1324_v26 }
  0x4f   :  { %876 = vmatpush.bf16.msra.mxu1 %v1332_v44 }
  0x52   :  { %792 = vmatpush.bf16.msra.mxu0 %v1323_v27 }
  0x53   :  { %877 = vmatpush.bf16.msra.mxu1 %v1331_v50 }
  0x56   :  { %793 = vmatpush.bf16.msra.mxu0 %v1322_v28 }
  0x57   :  { %878 = vmatpush.bf16.msra.mxu1 %v1330_v8 }
  0x5a   :  { %794 = vmatpush.bf16.msra.mxu0 %v1321_v29 }
  0x5b   :  { %879 = vmatpush.bf16.msra.mxu1 %v1329_v9 }
  0x5e   :  { %795 = vmatpush.bf16.msra.mxu0 %v1320_v31 }
  0x5f   :  { %880 = vmatpush.bf16.msra.mxu1 %v1328_v10 }
  0x62   :  { %796 = vmatpush.bf16.msra.mxu0 %v1319_v33 }
  0x63   :  { %881 = vmatpush.bf16.msra.mxu1 %v1327_v11 }
  0xa2   :  { %v615_v30 = vpop.f32.mrf.mxu0 }
  0xa3   :  { %v629_v32 = vpop.f32.mrf.mxu1  ;;  %v616_v37 = vadd.f32 %v1338_v34, %v615_v30 }
  0xa5   :  { %v630_v42 = vadd.f32 %v629_v32, %v616_v37 }
  0xaa   :  { %v643_v35 = vpop.f32.mrf.mxu2  ;;  %v617_v38 = vpop.f32.mrf.mxu0 }
  0xab   :  { %v657_v36 = vpop.f32.mrf.mxu3  ;;  %v631_v41 = vpop.f32.mrf.mxu1  ;;  %v618_v43 = vadd.f32 %v1338_v34, %v617_v38  ;;  %v644_v47 = vadd.f32 %v643_v35, %v630_v42 }
  0xad   :  { %v632_v48 = vadd.f32 %v631_v41, %v618_v43  ;;  %v658_v52 = vadd.f32 %v657_v36, %v644_v47 }
  0xb2   :  { %v645_v45 = vpop.f32.mrf.mxu2 }
  0xb3   :  { %v659_v46 = vpop.f32.mrf.mxu3  ;;  %v646_v53 = vadd.f32 %v645_v45, %v632_v48 }
  0xb5   :  { %v660_v57 = vadd.f32 %v659_v46, %v646_v53 }
  0xc2   :  { %v671_v49 = vpop.f32.mrf.mxu0 }
  0xc3   :  { %v685_v51 = vpop.f32.mrf.mxu1  ;;  %v672_v54 = vadd.f32 %v671_v49, %v658_v52 }
  0xc5   :  { %v686_v59 = vadd.f32 %v685_v51, %v672_v54 }
  0xca   :  { %v699_v55 = vpop.f32.mrf.mxu2  ;;  %v673_v58 = vpop.f32.mrf.mxu0 }
  0xcb   :  { %v713_v56 = vpop.f32.mrf.mxu3  ;;  %v674_v60 = vadd.f32 %v673_v58, %v660_v57  ;;  %v700_v61 = vadd.f32 %v699_v55, %v686_v59  ;;  %v687_v62 = vpop.f32.mrf.mxu1 }
  0xcd   :  { %v688_v63 = vadd.f32 %v687_v62, %v674_v60  ;;  %v714_v1 = vadd.f32 %v713_v56, %v700_v61 }
  0xcf   :  { %v718_v5 = vmax.f32 %v714_v1, 0.0 }
  0xd2   :  { %v701_v0 = vpop.f32.mrf.mxu2 }
  0xd3   :  { %v702_v2 = vadd.f32 %v701_v0, %v688_v63  ;;  %v715_v3 = vpop.f32.mrf.mxu3 }
  0xd5   :  { %v716_v4 = vadd.f32 %v715_v3, %v702_v2 }
  0xd7   :  { %v719_v6 = vmax.f32 %v716_v4, 0.0 }
  0xd9   :  { %v720_v7 = vpack.c.bf16 %v719_v6, %v718_v5 }
  0xdb   :  { %797 = vmatmul.bf16.vlgmr.msra.gmra.mxu0 %v720_v7 }
 0x158   :  { %v798_v12 = vpop.f32.mrf.mxu0 }
 0x159   :  { %v799_v14 = vadd.f32 %v1339_v13, %v798_v12 }
 0x15b   :  { %v803_v17 = vmax.f32 %v799_v14, 0.0 }
 0x160   :  { %v800_v15 = vpop.f32.mrf.mxu0 }
 0x161   :  { %v801_v16 = vadd.f32 %v1339_v13, %v800_v15 }
 0x163   :  { %v804_v18 = vmax.f32 %v801_v16, 0.0 }
 0x165   :  { %v805_v19 = vpack.c.bf16 %v804_v18, %v803_v17 }
 0x167   :  { %882 = vmatmul.bf16.vlgmr.msra.gmra.mxu1 %v805_v19 }
 0x1e4   :  { %v883_v21 = vpop.f32.mrf.mxu1 }
 0x1e5   :  { %v884_v22 = vadd.f32 %v1340_v20, %v883_v21 }
 0x1e7   :  { %888 = vst [vmem:[%s1531_s7] sm:$0xff] %v884_v22 }
 0x1ec   :  { %v885_v23 = vpop.f32.mrf.mxu1 }
 0x1ed   :  { %v886_v24 = vadd.f32 %v1340_v20, %v885_v23 }
 0x1ef   :  { %889 = vst [vmem:[%s1531_s7 + $0x8] sm:$0xff] %v886_v24 }
 0x1f0   :  { %894 = vsyncpa [#allocation3], 1 }

</bundles_post_ra>
